<compile_context>
chip_gen: v7x
topology: tpu7x:2x2x1
jax: 0.10.0
libtpu: 0.0.40
codegen_flags: <defaults>
</compile_context>

<pallas_src>
import jax
import jax.numpy as jnp
from jax.experimental import pallas as pl
from jax.experimental.pallas import tpu as pltpu

IN_FEATURES = 224
OUT_FEATURES = 100
K_PAD = 256    # contraction dim padded to a multiple of 128/256 (MXU aligned)
N_PAD = 128    # lane-dense output width (multiple of 128)
M_TILE_MAX = 128  # rows per grid step (fits all generations' VMEM comfortably)


def _round_up(a, b):
    return (a + b - 1) // b * b


def linear_add_relu_kernel(x_ref, wt_ref, bo_ref, o_ref):
    # x_ref:  (M_TILE, 256)  VMEM bf16   padded/cast activations
    # wt_ref: (256, 128)     VMEM bf16   pre-transposed, K/N-padded weight
    # bo_ref: (1, 128)       VMEM f32    fused (bias + other), lane-padded
    # o_ref:  (M_TILE, 128)  VMEM f32    lane- and sublane-dense output
    y = jnp.dot(x_ref[...], wt_ref[...], preferred_element_type=jnp.float32)
    o_ref[...] = jnp.maximum(y + bo_ref[...], 0.0).astype(o_ref.dtype)


def prepare_params(weight, bias, other):
    """One-time parameter prep, hoisted out of the per-call hot path.

    weight: (100, 224) torch-layout Linear weight
    bias:   (100,)
    other:  (100,)  (the module's free variable, assumed constant per call)
    Returns:
      wt_padded:         (256, 128) bf16, transposed + zero-padded K/N
      bias_other_padded: (1, 128)   f32,  bias + other, zero-padded lanes
    """
    wt = jnp.zeros((K_PAD, N_PAD), jnp.bfloat16)
    wt = wt.at[:IN_FEATURES, :OUT_FEATURES].set(weight.T.astype(jnp.bfloat16))
    bo = jnp.zeros((1, N_PAD), jnp.float32)
    bo = bo.at[0, :OUT_FEATURES].set(
        bias.astype(jnp.float32) + other.astype(jnp.float32))
    return wt, bo


@jax.jit
def model_forward(x, wt_padded, bias_other_padded):
    """x: (224,) or (M, 224) -> (100,) or (M, 100).  Params pre-prepared."""
    squeeze = (x.ndim == 1)
    x2d = x.reshape(-1, IN_FEATURES)
    M = x2d.shape[0]

    m_tile = min(M_TILE_MAX, _round_up(max(M, 1), 8))
    m_pad = _round_up(M, m_tile)
    grid = (m_pad // m_tile,)

    # Single fused pad + bf16 cast (zero rows/cols contribute 0 to the dot).
    x_p = jnp.zeros((m_pad, K_PAD), jnp.bfloat16)
    x_p = x_p.at[:M, :IN_FEATURES].set(x2d.astype(jnp.bfloat16))

    cost = pl.CostEstimate(
        flops=2 * m_pad * K_PAD * N_PAD,
        transcendentals=0,
        bytes_accessed=(x_p.size * 2            # bf16 activations
                        + wt_padded.size * 2    # bf16 weight (resident, ~once)
                        + bias_other_padded.size * 4
                        + m_pad * N_PAD * 4),   # f32 output
    )

    out = pl.pallas_call(
        linear_add_relu_kernel,
        out_shape=jax.ShapeDtypeStruct((m_pad, N_PAD), jnp.float32),
        grid=grid,
        in_specs=[
            pl.BlockSpec((m_tile, K_PAD), lambda i: (i, 0)),
            # Weight / bias blocks: same block index every step -> DMA'd once,
            # stays resident in VMEM across the whole grid.
            pl.BlockSpec((K_PAD, N_PAD), lambda i: (0, 0)),
            pl.BlockSpec((1, N_PAD), lambda i: (0, 0)),
        ],
        out_specs=pl.BlockSpec((m_tile, N_PAD), lambda i: (i, 0)),
        compiler_params=pltpu.CompilerParams(
            dimension_semantics=("parallel",)),
        cost_estimate=cost,
    )(x_p, wt_padded, bias_other_padded)

    # Padded lanes are exactly zero (zero weight cols + zero bias); padded
    # rows are sliced off together with them.
    result = out[:M, :OUT_FEATURES]
    if squeeze:
        result = result[0]
    return result


if __name__ == "__main__":
    key = jax.random.PRNGKey(0)
    k_x, k_w, k_b, k_o, k_xb = jax.random.split(key, 5)

    # Deterministic inputs / parameters (torch.nn.Linear(224, 100) layout).
    x1 = jax.random.normal(k_x, (IN_FEATURES,), dtype=jnp.float32)
    bound = 1.0 / (IN_FEATURES ** 0.5)
    weight = jax.random.uniform(
        k_w, (OUT_FEATURES, IN_FEATURES), minval=-bound, maxval=bound,
        dtype=jnp.float32)
    bias = jax.random.uniform(
        k_b, (OUT_FEATURES,), minval=-bound, maxval=bound, dtype=jnp.float32)
    other = jax.random.normal(k_o, (OUT_FEATURES,), dtype=jnp.float32)

    # One-time parameter preparation (hoisted out of the forward).
    wt_padded, bias_other_padded = prepare_params(weight, bias, other)
    wt_padded = jax.block_until_ready(wt_padded)
    bias_other_padded = jax.block_until_ready(bias_other_padded)

    # --- Spec case: single (224,) vector, as in the original module. ---
    out = model_forward(x1, wt_padded, bias_other_padded)
    out = jax.block_until_ready(out)
    ref = jnp.maximum(x1 @ weight.T + bias + other, 0.0)
    assert out.shape == (OUT_FEATURES,)
    # bf16 weights/activations with f32 accumulate -> relaxed tolerances.
    assert jnp.allclose(out, ref, atol=5e-2, rtol=5e-2)

    # --- Batched case: exercises grid > 1 and M padding (200 -> 256 rows). ---
    xb = jax.random.normal(k_xb, (200, IN_FEATURES), dtype=jnp.float32)
    out_b = model_forward(xb, wt_padded, bias_other_padded)
    out_b = jax.block_until_ready(out_b)
    ref_b = jnp.maximum(xb @ weight.T + bias + other, 0.0)
    assert out_b.shape == (200, OUT_FEATURES)
    assert jnp.allclose(out_b, ref_b, atol=5e-2, rtol=5e-2)

    print("KERNEL_OK")
</pallas_src>

<mosaic_0001>
module attributes {stable_mosaic.version = 11 : i64} {
  func.func @linear_add_relu_kernel(%arg0: i32, %arg1: memref<8x256xbf16, #tpu.memory_space<vmem>>, %arg2: memref<256x128xbf16, #tpu.memory_space<vmem>>, %arg3: memref<1x128xf32, #tpu.memory_space<vmem>>, %arg4: memref<8x128xf32, #tpu.memory_space<vmem>>) attributes {dimension_semantics = [#tpu.dimension_semantics<parallel>], iteration_bounds = array<i64: 1>, scalar_prefetch = 0 : i64, scratch_operands = 0 : i64, tpu.core_type = #tpu.core_type<tc>, window_params = [{transform_indices = @transform_0, window_bounds = array<i64: 8, 256>}, {pipeline_mode = #tpu.pipeline_mode<synchronous>, transform_indices = @transform_1, window_bounds = array<i64: 256, 128>}, {pipeline_mode = #tpu.pipeline_mode<synchronous>, transform_indices = @transform_2, window_bounds = array<i64: 1, 128>}, {transform_indices = @transform_3, window_bounds = array<i64: 8, 128>}]} {
    %c0 = arith.constant 0 : index
    %c0_0 = arith.constant 0 : index
    %0 = vector.load %arg1[%c0, %c0_0] : memref<8x256xbf16, #tpu.memory_space<vmem>>, vector<8x256xbf16>
    %c0_1 = arith.constant 0 : index
    %c0_2 = arith.constant 0 : index
    %1 = vector.load %arg2[%c0_1, %c0_2] : memref<256x128xbf16, #tpu.memory_space<vmem>>, vector<256x128xbf16>
    %cst = arith.constant dense<0.000000e+00> : vector<8x128xf32>
    %2 = tpu.matmul %0, %1, %cst {dimension_numbers = #tpu.dot_dimension_numbers<[1], [0], [0], [1], [0, 0, 1, 1], [], []>} : vector<8x256xbf16>, vector<256x128xbf16>, vector<8x128xf32> -> vector<8x128xf32>
    %c0_3 = arith.constant 0 : index
    %c0_4 = arith.constant 0 : index
    %3 = vector.load %arg3[%c0_3, %c0_4] : memref<1x128xf32, #tpu.memory_space<vmem>>, vector<1x128xf32>
    %4 = vector.broadcast %3 : vector<1x128xf32> to vector<8x128xf32>
    %5 = arith.addf %2, %4 : vector<8x128xf32>
    %cst_5 = arith.constant 0.000000e+00 : f32
    %6 = vector.broadcast %cst_5 : f32 to vector<8x128xf32>
    %7 = arith.maximumf %5, %6 : vector<8x128xf32>
    %c0_6 = arith.constant 0 : index
    %c0_7 = arith.constant 0 : index
    %8 = vector.load %arg4[%c0_6, %c0_7] : memref<8x128xf32, #tpu.memory_space<vmem>>, vector<8x128xf32>
    tpu.vector_store %arg4[%c0_6, %c0_7], %7 {strides = array<i32>} : memref<8x128xf32, #tpu.memory_space<vmem>>, vector<8x128xf32>,
    return
  }
  func.func @transform_0(%arg0: i32) -> (i32, i32) {
    %c0_i32 = arith.constant 0 : i32
    %c0_i32_0 = arith.constant 0 : i32
    return %arg0, %c0_i32 : i32, i32
  }
  func.func @transform_1(%arg0: i32) -> (i32, i32) {
    %c0_i32 = arith.constant 0 : i32
    %c0_i32_0 = arith.constant 0 : i32
    %c0_i32_1 = arith.constant 0 : i32
    return %c0_i32, %c0_i32_0 : i32, i32
  }
  func.func @transform_2(%arg0: i32) -> (i32, i32) {
    %c0_i32 = arith.constant 0 : i32
    %c0_i32_0 = arith.constant 0 : i32
    %c0_i32_1 = arith.constant 0 : i32
    return %c0_i32, %c0_i32_0 : i32, i32
  }
  func.func @transform_3(%arg0: i32) -> (i32, i32) {
    %c0_i32 = arith.constant 0 : i32
    %c0_i32_0 = arith.constant 0 : i32
    return %arg0, %c0_i32 : i32, i32
  }
}

</mosaic_0001>

<bundles_post_ra>
// kernel: model_forward.1
= control target key start
LH: loop header
LB: loop body
LE: loop exit
PB: predicated region body
PF: predicated region fallthrough
CT: control target
= control target key end

     0   :  { %8 = vsyncpa [#allocation3], 0  ;;  %s305_s12 = smov [#allocation2]   ;;  %s349_s0 = inlined_call_operand.vmem [shape: bf16[8,256], index: 0, kind: input, shape index: {}]   ;;  %s350_s1 = inlined_call_operand.hbm [shape: bf16[256,128], index: 1, kind: input, shape index: {}]   ;;  %s351_s2 = inlined_call_operand.vmem [shape: f32[1,128], index: 2, kind: input, shape index: {}]   ;;  %s352_s3 = inlined_call_operand.vmem [shape: f32[8,128], index: 3, kind: output, shape index: {}]  }
   0x1   :  { %s16_s13 = sshll.u32 %s305_s12, 4  ;;  %s281_s16 = scalar_lea.hbm %s350_s1, 2048  ;;  %s17_s13 = int_to_ptr.vmem [resolvable:$true] %s16_s13 }
   0x2   :  { %p282_p0 = scmp.ne.s32.totalorder %s350_s1, %s281_s16  ;;  %p285_p1 = scmp.lt.u32.totalorder %s281_s16, %s350_s1 }
   0x4   :  { %p287_p2 = pnand %p285_p1, %p282_p0 }
   0x6   :  { %290 = shalt.err (!%p287_p2)
}
   0x7   :  { %s291_s21 = scalar_lea.vmem %s17_s13, 2048  ;;  %p296_p4 = scmp.lt.s32.totalorder %s17_s13, %s17_s13 }
   0x8   :  { %p292_p3 = scmp.ne.s32.totalorder %s17_s13, %s291_s21  ;;  %p297_p5 = scmp.lt.s32.totalorder %s291_s21, %s291_s21 }
   0xa   :  { %p298_p6 = por %p297_p5, %p296_p4 }
   0xc   :  { %p299_p7 = pnand %p298_p6, %p292_p3 }
   0xe   :  { %302 = shalt.err (!%p299_p7)
}
   0xf   :  { %s306_s22 = smov 64   ;;  %s307_s23 = smov 4  }
  0x10   :  { %22 = dma.hbm_to_vmem [thread:$0]  %s350_s1, 2048, %s17_s13, [#allocation3], %s306_s22, %s306_s22, %s307_s23  }
  0x11   :  { %303 = dma.done.wait [#allocation3], 2048  }
  0x12   :  { %304 = vsyncadd [#allocation3], 4294965248  ;;  %v263_v0 = vld [vmem:[#allocation2 + $0x40] sm:$0xff]   ;;  %v265_v2 = vld [vmem:[#allocation2 + $0x48] sm:$0xff]  }
  0x13   :  { %v264_v1 = vld [vmem:[#allocation2] sm:$0xff]   ;;  %238 = vmatprep.subr.bf16.mxu0 %v263_v0  ;;  %v266_v3 = vld [vmem:[#allocation2 + $0x8] sm:$0xff]   ;;  %v267_v4 = vld [vmem:[#allocation2 + $0x50] sm:$0xff]  }
  0x14   :  { %239 = vmatpush3.bf16.msra.mxu0 %v264_v1  ;;  %v268_v5 = vld [vmem:[#allocation2 + $0x10] sm:$0xff]   ;;  %v269_v6 = vld [vmem:[#allocation2 + $0x58] sm:$0xff]   ;;  %v271_v8 = vld [vmem:[#allocation2 + $0x60] sm:$0xff]  }
  0x15   :  { %240 = vmatprep.subr.bf16.mxu0 %v265_v2  ;;  %v270_v7 = vld [vmem:[#allocation2 + $0x18] sm:$0xff]   ;;  %v272_v9 = vld [vmem:[#allocation2 + $0x20] sm:$0xff]   ;;  %v273_v10 = vld [vmem:[#allocation2 + $0x68] sm:$0xff]  }
  0x16   :  { %v29_v11 = vld [vmem:[%s349_s0] sm:$0xff]  ;;  %v274_v13 = vld [vmem:[#allocation2 + $0x28] sm:$0xff]   ;;  %v275_v14 = vld [vmem:[#allocation2 + $0x70] sm:$0xff]  }
  0x17   :  { %v221_v12 = vcombine.high %v29_v11, %v29_v11  ;;  %v276_v15 = vld [vmem:[#allocation2 + $0x30] sm:$0xff]   ;;  %v277_v16 = vld [vmem:[#allocation2 + $0x78] sm:$0xff]   ;;  %v220_v18 = vcombine.low %v29_v11, %v29_v11  ;;  %v219_v20 = vld [vmem:[%s351_s2] ss:$0 sm:$0xff] }
  0x18   :  { %241 = vmatpush3.bf16.msra.mxu0 %v266_v3  ;;  %v278_v17 = vld [vmem:[#allocation2 + $0x38] sm:$0xff]  }
  0x19   :  { %242 = vmatprep.subr.bf16.mxu0 %v267_v4  ;;  %204 = vmatprep.mubr.bf16.mxu0 %v221_v12 }
  0x1c   :  { %243 = vmatpush3.bf16.msra.mxu0 %v268_v5 }
  0x1d   :  { %244 = vmatprep.subr.bf16.mxu0 %v269_v6 }
  0x20   :  { %245 = vmatpush3.bf16.msra.mxu0 %v270_v7 }
  0x21   :  { %246 = vmatprep.subr.bf16.mxu0 %v271_v8 }
  0x24   :  { %247 = vmatpush3.bf16.msra.mxu0 %v272_v9 }
  0x25   :  { %248 = vmatprep.subr.bf16.mxu0 %v273_v10 }
  0x28   :  { %249 = vmatpush3.bf16.msra.mxu0 %v274_v13 }
  0x29   :  { %250 = vmatprep.subr.bf16.mxu0 %v275_v14 }
  0x2c   :  { %251 = vmatpush3.bf16.msra.mxu0 %v276_v15 }
  0x2d   :  { %252 = vmatprep.subr.bf16.mxu0 %v277_v16 }
  0x30   :  { %253 = vmatpush3.bf16.msra.mxu0 %v278_v17 }
  0x33   :  { %205 = vmatmul.mubr.bf16.vlgmr.msra.gmra.mrb[0].mxu0 %v220_v18 }
 0x106   :  { %v254_v19 = vpop.f32.mrb[0].mxu0 }
 0x107   :  { %v255_v21 = vpop.f32.mrb[1].mxu0 }
 0x108   :  { %v256_v22 = vadd.f32 %v255_v21, %v254_v19  ;;  %v257_v23 = vpop.f32.mrb[2].mxu0 }
 0x109   :  { %v258_v24 = vpop.f32.mrb[3].mxu0 }
 0x10a   :  { %v207_v25 = vadd.f32 %v256_v22, %v219_v20 }
 0x10c   :  { %v212_v26 = vmax.f32 %v207_v25, 0.0 }
 0x10e   :  { %213 = vst [vmem:[%s352_s3] sm:$0xff] %v212_v26 }
 0x10f   :  { %218 = vsyncpa [#allocation3], 1 }

</bundles_post_ra>
